<compile_context>
chip_gen: v6e
topology: v6e:2x2x1
jax: 0.10.0
libtpu: 0.0.40
codegen_flags: <defaults>
</compile_context>

<pallas_src>
import functools

import jax
import jax.numpy as jnp
from jax import lax
from jax.experimental import pallas as pl
from jax.experimental.pallas import tpu as pltpu


def _triple(v):
    return (v, v, v) if isinstance(v, int) else tuple(v)


def _round_up(a, b):
    return ((a + b - 1) // b) * b


def _conv_stats_kernel(w_ref, p_ref, y_ref, sum_ref, sq_ref, acc_ref, *, cout):
    """Conv as W @ P on the MXU (bf16 in / f32 acc) + fused per-channel sum / sum-of-squares.

    Grid: (N, S_tiles, K_tiles) -- K (reduction) innermost.
      w_ref   : (Cout_p, tk)   bf16
      p_ref   : (tk, ts)       bf16   (leading N dim squeezed)
      y_ref   : (Cout, ts)     f32    (leading N dim squeezed)
      sum_ref : (Cout_p, 1)    f32    accumulated over the whole grid
      sq_ref  : (Cout_p, 1)    f32    accumulated over the whole grid
      acc_ref : (Cout_p, ts)   f32    VMEM scratch (K accumulator)
    """
    n = pl.program_id(0)
    s = pl.program_id(1)
    k = pl.program_id(2)
    nk = pl.num_programs(2)

    @pl.when((n == 0) & (s == 0) & (k == 0))
    def _():
        sum_ref[...] = jnp.zeros_like(sum_ref)
        sq_ref[...] = jnp.zeros_like(sq_ref)

    @pl.when(k == 0)
    def _():
        acc_ref[...] = jnp.zeros_like(acc_ref)

    acc_ref[...] += jnp.dot(w_ref[...], p_ref[...],
                            preferred_element_type=jnp.float32)

    @pl.when(k == nk - 1)
    def _():
        acc = acc_ref[...]
        # Padded spatial columns are exactly zero (zero patches, no bias), so they
        # contribute nothing to the batch statistics -- no masking needed.
        y_ref[...] = acc[:cout, :]
        sum_ref[...] += jnp.sum(acc, axis=1, keepdims=True)
        sq_ref[...] += jnp.sum(acc * acc, axis=1, keepdims=True)


def _bn_relu_kernel(y_ref, scale_ref, shift_ref, o_ref):
    """Per-channel affine (precomputed scale/shift) + ReLU on a (Cout, ts) tile."""
    o_ref[...] = jnp.maximum(y_ref[...] * scale_ref[...] + shift_ref[...], 0.0)


def conv_bn_relu_forward(x, conv_w, conv_b, bn_gamma, bn_beta,
                         stride=1, padding=0, dilation=1, eps=1e-5,
                         tile_s=512, tile_k=1024):
    """Forward pass of conv_bn_relu (training-mode BN). Returns NCDHW output."""
    sd, sh, sw = _triple(stride)
    pd, ph, pw = _triple(padding)
    dd, dh, dw = _triple(dilation)

    N, Cin, D, H, W = x.shape
    Cout, Cin_w, kd, kh, kw = conv_w.shape
    assert Cin_w == Cin, "groups > 1 not supported"

    Do = (D + 2 * pd - dd * (kd - 1) - 1) // sd + 1
    Ho = (H + 2 * ph - dh * (kh - 1) - 1) // sh + 1
    Wo = (W + 2 * pw - dw * (kw - 1) - 1) // sw + 1
    S = Do * Ho * Wo
    K = Cin * kd * kh * kw

    # conv_b is mathematically cancelled by training-mode BN (batch-mean subtraction),
    # so it is intentionally not used -- output is identical, one less DMA + VPU add.
    del conv_b

    # ---- im2col, K-major, bf16 (MXU-native operand; half the HBM traffic of f32) ----
    xb = jnp.pad(x.astype(jnp.bfloat16),
                 ((0, 0), (0, 0), (pd, pd), (ph, ph), (pw, pw)))
    slices = []
    for a in range(kd):
        for b in range(kh):
            for c in range(kw):
                oa, ob, oc = a * dd, b * dh, c * dw
                slices.append(xb[:, :,
                                 oa: oa + sd * (Do - 1) + 1: sd,
                                 ob: ob + sh * (Ho - 1) + 1: sh,
                                 oc: oc + sw * (Wo - 1) + 1: sw])
    # (N, Cin, kpos, Do, Ho, Wo) -> (N, K, S); K order matches PyTorch weight flattening.
    patches = jnp.stack(slices, axis=2).reshape(N, K, S)

    # ---- pad to TPU-friendly tile sizes ----
    Cout_p = _round_up(Cout, 8)                       # channel axis -> sublanes
    K_p = _round_up(K, 128)
    tk = min(_round_up(tile_k, 128), K_p)
    K_p = _round_up(K_p, tk)
    ts = min(_round_up(tile_s, 128), _round_up(S, 128))   # spatial axis -> lanes (dense)
    S_p = _round_up(S, ts)

    patches = jnp.pad(patches, ((0, 0), (0, K_p - K), (0, S_p - S)))
    w_p = jnp.pad(conv_w.reshape(Cout, K).astype(jnp.bfloat16),
                  ((0, Cout_p - Cout), (0, K_p - K)))

    grid1 = (N, S_p // ts, K_p // tk)

    # ---- Pallas kernel 1: conv matmul (bf16 x bf16 -> f32) + fused channel stats ----
    # TODO(synk): for v7x megacore, restructure to per-core partial stats so the leading
    #             grid axes can be marked "parallel".
    y, csum, csq = pl.pallas_call(
        functools.partial(_conv_stats_kernel, cout=Cout),
        out_shape=(jax.ShapeDtypeStruct((N, Cout, S_p), jnp.float32),
                   jax.ShapeDtypeStruct((Cout_p, 1), jnp.float32),
                   jax.ShapeDtypeStruct((Cout_p, 1), jnp.float32)),
        grid=grid1,
        in_specs=[pl.BlockSpec((Cout_p, tk), lambda n, s, k: (0, k)),
                  pl.BlockSpec((None, tk, ts), lambda n, s, k: (n, k, s))],
        out_specs=(pl.BlockSpec((None, Cout, ts), lambda n, s, k: (n, 0, s)),
                   pl.BlockSpec((Cout_p, 1), lambda n, s, k: (0, 0)),
                   pl.BlockSpec((Cout_p, 1), lambda n, s, k: (0, 0))),
        scratch_shapes=[pltpu.VMEM((Cout_p, ts), jnp.float32)],
        compiler_params=pltpu.CompilerParams(
            dimension_semantics=("arbitrary", "arbitrary", "arbitrary")),
    )(w_p, patches)

    # ---- per-channel BN scale/shift (tiny, hoisted out of the per-tile loop) ----
    m_total = N * S
    mean = csum[:Cout, 0] / m_total
    var = jnp.maximum(csq[:Cout, 0] / m_total - mean * mean, 0.0)  # biased var (BN train)
    inv = lax.rsqrt(var + eps)
    scale = bn_gamma.astype(jnp.float32) * inv
    shift = bn_beta.astype(jnp.float32) - mean * scale
    scale2 = scale.reshape(Cout, 1)
    shift2 = shift.reshape(Cout, 1)

    # ---- Pallas kernel 2: BN affine + ReLU, in place over y, lane-dense tiles ----
    out_full = pl.pallas_call(
        _bn_relu_kernel,
        out_shape=jax.ShapeDtypeStruct((N, Cout, S_p), jnp.float32),
        grid=(N, S_p // ts),
        in_specs=[pl.BlockSpec((None, Cout, ts), lambda n, s: (n, 0, s)),
                  pl.BlockSpec((Cout, 1), lambda n, s: (0, 0)),
                  pl.BlockSpec((Cout, 1), lambda n, s: (0, 0))],
        out_specs=pl.BlockSpec((None, Cout, ts), lambda n, s: (n, 0, s)),
        input_output_aliases={0: 0},
        compiler_params=pltpu.CompilerParams(
            dimension_semantics=("parallel", "parallel")),
    )(y, scale2, shift2)

    # Output is already channel-major: pure reshape back to NCDHW (no transpose pass).
    return out_full[:, :, :S].reshape(N, Cout, Do, Ho, Wo)


def _reference(x, w, b, g, bt, stride, padding, dilation, eps=1e-5):
    dn = lax.conv_dimension_numbers(x.shape, w.shape, ('NCDHW', 'OIDHW', 'NCDHW'))
    y = lax.conv_general_dilated(
        x, w, window_strides=_triple(stride),
        padding=[(p, p) for p in _triple(padding)],
        rhs_dilation=_triple(dilation), dimension_numbers=dn)
    y = y + b.reshape(1, -1, 1, 1, 1)
    mean = jnp.mean(y, axis=(0, 2, 3, 4), keepdims=True)
    var = jnp.mean((y - mean) ** 2, axis=(0, 2, 3, 4), keepdims=True)
    yn = (y - mean) / jnp.sqrt(var + eps)
    yn = yn * g.reshape(1, -1, 1, 1, 1) + bt.reshape(1, -1, 1, 1, 1)
    return jnp.maximum(yn, 0.0)


if __name__ == "__main__":
    key = jax.random.PRNGKey(0)
    k1, k2, k3 = jax.random.split(key, 3)

    # Small shapes consistent with a Conv3d block: NCDHW input.
    N, Cin, D, H, W = 2, 4, 8, 8, 8
    Cout, ksz = 8, 3
    stride, padding, dilation = 1, 1, 1

    x = jax.random.normal(k1, (N, Cin, D, H, W), jnp.float32)
    conv_w = jax.random.normal(k2, (Cout, Cin, ksz, ksz, ksz), jnp.float32) * 0.1
    conv_b = jax.random.normal(k3, (Cout,), jnp.float32) * 0.1
    bn_gamma = jnp.ones((Cout,), jnp.float32)   # BatchNorm3d default init (weight=1)
    bn_beta = jnp.zeros((Cout,), jnp.float32)   # BatchNorm3d default init (bias=0)

    fwd = jax.jit(functools.partial(conv_bn_relu_forward,
                                    stride=stride, padding=padding, dilation=dilation))
    out = jax.block_until_ready(fwd(x, conv_w, conv_b, bn_gamma, bn_beta))

    ref = _reference(x, conv_w, conv_b, bn_gamma, bn_beta, stride, padding, dilation)
    assert out.shape == ref.shape, (out.shape, ref.shape)
    # bf16 MXU operands (f32 accumulation) vs an all-f32 XLA reference -> relaxed tolerance.
    if not jnp.allclose(out, ref, atol=2e-2, rtol=2e-2):
        max_err = float(jnp.max(jnp.abs(out - ref)))
        raise AssertionError(f"mismatch vs reference, max abs err = {max_err}")
    print("KERNEL_OK")
</pallas_src>

<mosaic_0001>
module attributes {stable_mosaic.version = 11 : i64} {
  func.func @_conv_stats_kernel(%arg0: i32, %arg1: i32, %arg2: i32, %arg3: memref<8x128xbf16, #tpu.memory_space<vmem>>, %arg4: memref<1x128x512xbf16, #tpu.memory_space<vmem>>, %arg5: memref<1x8x512xf32, #tpu.memory_space<vmem>>, %arg6: memref<8x1xf32, #tpu.memory_space<vmem>>, %arg7: memref<8x1xf32, #tpu.memory_space<vmem>>, %arg8: memref<8x512xf32, #tpu.memory_space<vmem>>) attributes {dimension_semantics = [#tpu.dimension_semantics<arbitrary>, #tpu.dimension_semantics<arbitrary>, #tpu.dimension_semantics<arbitrary>], iteration_bounds = array<i64: 2, 1, 1>, scalar_prefetch = 0 : i64, scratch_operands = 1 : i64, tpu.core_type = #tpu.core_type<tc>, window_params = [{transform_indices = @transform_0, window_bounds = array<i64: 8, 128>}, {transform_indices = @transform_1, window_bounds = array<i64: 1, 128, 512>}, {transform_indices = @transform_2, window_bounds = array<i64: 1, 8, 512>}, {pipeline_mode = #tpu.pipeline_mode<synchronous>, transform_indices = @transform_3, window_bounds = array<i64: 8, 1>}, {pipeline_mode = #tpu.pipeline_mode<synchronous>, transform_indices = @transform_4, window_bounds = array<i64: 8, 1>}]} {
    %c0_i32 = arith.constant 0 : i32
    %0 = arith.cmpi eq, %arg0, %c0_i32 : i32
    %c0_i32_0 = arith.constant 0 : i32
    %1 = arith.cmpi eq, %arg1, %c0_i32_0 : i32
    %2 = arith.andi %0, %1 : i1
    %c0_i32_1 = arith.constant 0 : i32
    %3 = arith.cmpi eq, %arg2, %c0_i32_1 : i32
    %4 = arith.andi %2, %3 : i1
    %5 = arith.extui %4 : i1 to i32
    %c0_i32_2 = arith.constant 0 : i32
    %6 = arith.cmpi ne, %5, %c0_i32_2 : i32
    scf.if %6 {
      %cst_15 = arith.constant 0.000000e+00 : f32
      %20 = vector.broadcast %cst_15 : f32 to vector<8x1xf32>
      %c0_16 = arith.constant 0 : index
      %c0_17 = arith.constant 0 : index
      %21 = vector.load %arg6[%c0_16, %c0_17] : memref<8x1xf32, #tpu.memory_space<vmem>>, vector<8x1xf32>
      tpu.vector_store %arg6[%c0_16, %c0_17], %20 {strides = array<i32>} : memref<8x1xf32, #tpu.memory_space<vmem>>, vector<8x1xf32>,
      %cst_18 = arith.constant 0.000000e+00 : f32
      %22 = vector.broadcast %cst_18 : f32 to vector<8x1xf32>
      %c0_19 = arith.constant 0 : index
      %c0_20 = arith.constant 0 : index
      %23 = vector.load %arg7[%c0_19, %c0_20] : memref<8x1xf32, #tpu.memory_space<vmem>>, vector<8x1xf32>
      tpu.vector_store %arg7[%c0_19, %c0_20], %22 {strides = array<i32>} : memref<8x1xf32, #tpu.memory_space<vmem>>, vector<8x1xf32>,
    } else {
    }
    %c0_i32_3 = arith.constant 0 : i32
    %7 = arith.cmpi eq, %arg2, %c0_i32_3 : i32
    %8 = arith.extui %7 : i1 to i32
    %c0_i32_4 = arith.constant 0 : i32
    %9 = arith.cmpi ne, %8, %c0_i32_4 : i32
    scf.if %9 {
      %cst_15 = arith.constant 0.000000e+00 : f32
      %20 = vector.broadcast %cst_15 : f32 to vector<8x512xf32>
      %c0_16 = arith.constant 0 : index
      %c0_17 = arith.constant 0 : index
      %21 = vector.load %arg8[%c0_16, %c0_17] : memref<8x512xf32, #tpu.memory_space<vmem>>, vector<8x512xf32>
      tpu.vector_store %arg8[%c0_16, %c0_17], %20 {strides = array<i32>} : memref<8x512xf32, #tpu.memory_space<vmem>>, vector<8x512xf32>,
    } else {
    }
    %c0 = arith.constant 0 : index
    %c0_5 = arith.constant 0 : index
    %10 = vector.load %arg8[%c0, %c0_5] : memref<8x512xf32, #tpu.memory_space<vmem>>, vector<8x512xf32>
    %c0_6 = arith.constant 0 : index
    %c0_7 = arith.constant 0 : index
    %11 = vector.load %arg3[%c0_6, %c0_7] : memref<8x128xbf16, #tpu.memory_space<vmem>>, vector<8x128xbf16>
    %c0_8 = arith.constant 0 : index
    %c0_9 = arith.constant 0 : index
    %c0_10 = arith.constant 0 : index
    %12 = vector.load %arg4[%c0_8, %c0_9, %c0_10] : memref<1x128x512xbf16, #tpu.memory_space<vmem>>, vector<1x128x512xbf16>
    %13 = vector.shape_cast %12 : vector<1x128x512xbf16> to vector<128x512xbf16>
    %cst = arith.constant dense<0.000000e+00> : vector<8x512xf32>
    %14 = tpu.matmul %11, %13, %cst {dimension_numbers = #tpu.dot_dimension_numbers<[1], [0], [0], [1], [0, 0, 1, 1], [], []>} : vector<8x128xbf16>, vector<128x512xbf16>, vector<8x512xf32> -> vector<8x512xf32>
    %15 = arith.addf %10, %14 : vector<8x512xf32>
    %c0_11 = arith.constant 0 : index
    %c0_12 = arith.constant 0 : index
    %16 = vector.load %arg8[%c0_11, %c0_12] : memref<8x512xf32, #tpu.memory_space<vmem>>, vector<8x512xf32>
    tpu.vector_store %arg8[%c0_11, %c0_12], %15 {strides = array<i32>} : memref<8x512xf32, #tpu.memory_space<vmem>>, vector<8x512xf32>,
    %c0_i32_13 = arith.constant 0 : i32
    %17 = arith.cmpi eq, %arg2, %c0_i32_13 : i32
    %18 = arith.extui %17 : i1 to i32
    %c0_i32_14 = arith.constant 0 : i32
    %19 = arith.cmpi ne, %18, %c0_i32_14 : i32
    scf.if %19 {
      %c0_15 = arith.constant 0 : index
      %c0_16 = arith.constant 0 : index
      %20 = vector.load %arg8[%c0_15, %c0_16] : memref<8x512xf32, #tpu.memory_space<vmem>>, vector<8x512xf32>
      %c0_17 = arith.constant 0 : index
      %c0_18 = arith.constant 0 : index
      %c0_19 = arith.constant 0 : index
      %21 = vector.load %arg5[%c0_17, %c0_18, %c0_19] : memref<1x8x512xf32, #tpu.memory_space<vmem>>, vector<1x8x512xf32>
      %22 = vector.shape_cast %21 : vector<1x8x512xf32> to vector<8x512xf32>
      %23 = vector.shape_cast %20 : vector<8x512xf32> to vector<1x8x512xf32>
      tpu.vector_store %arg5[%c0_17, %c0_18, %c0_19], %23 {strides = array<i32>} : memref<1x8x512xf32, #tpu.memory_space<vmem>>, vector<1x8x512xf32>,
      %c0_20 = arith.constant 0 : index
      %c0_21 = arith.constant 0 : index
      %24 = vector.load %arg6[%c0_20, %c0_21] : memref<8x1xf32, #tpu.memory_space<vmem>>, vector<8x1xf32>
      %cst_22 = arith.constant dense<0.000000e+00> : vector<8xf32>
      %25 = vector.multi_reduction <add>, %20, %cst_22 [1] : vector<8x512xf32> to vector<8xf32>
      %26 = vector.shape_cast %25 : vector<8xf32> to vector<8x1xf32>
      %27 = arith.addf %24, %26 : vector<8x1xf32>
      %c0_23 = arith.constant 0 : index
      %c0_24 = arith.constant 0 : index
      %28 = vector.load %arg6[%c0_23, %c0_24] : memref<8x1xf32, #tpu.memory_space<vmem>>, vector<8x1xf32>
      tpu.vector_store %arg6[%c0_23, %c0_24], %27 {strides = array<i32>} : memref<8x1xf32, #tpu.memory_space<vmem>>, vector<8x1xf32>,
      %c0_25 = arith.constant 0 : index
      %c0_26 = arith.constant 0 : index
      %29 = vector.load %arg7[%c0_25, %c0_26] : memref<8x1xf32, #tpu.memory_space<vmem>>, vector<8x1xf32>
      %30 = arith.mulf %20, %20 : vector<8x512xf32>
      %cst_27 = arith.constant dense<0.000000e+00> : vector<8xf32>
      %31 = vector.multi_reduction <add>, %30, %cst_27 [1] : vector<8x512xf32> to vector<8xf32>
      %32 = vector.shape_cast %31 : vector<8xf32> to vector<8x1xf32>
      %33 = arith.addf %29, %32 : vector<8x1xf32>
      %c0_28 = arith.constant 0 : index
      %c0_29 = arith.constant 0 : index
      %34 = vector.load %arg7[%c0_28, %c0_29] : memref<8x1xf32, #tpu.memory_space<vmem>>, vector<8x1xf32>
      tpu.vector_store %arg7[%c0_28, %c0_29], %33 {strides = array<i32>} : memref<8x1xf32, #tpu.memory_space<vmem>>, vector<8x1xf32>,
    } else {
    }
    return
  }
  func.func @transform_0(%arg0: i32, %arg1: i32, %arg2: i32) -> (i32, i32) {
    %c0_i32 = arith.constant 0 : i32
    %c0_i32_0 = arith.constant 0 : i32
    return %c0_i32, %arg2 : i32, i32
  }
  func.func @transform_1(%arg0: i32, %arg1: i32, %arg2: i32) -> (i32, i32, i32) {
    %c0_i32 = arith.constant 0 : i32
    return %arg0, %arg2, %arg1 : i32, i32, i32
  }
  func.func @transform_2(%arg0: i32, %arg1: i32, %arg2: i32) -> (i32, i32, i32) {
    %c0_i32 = arith.constant 0 : i32
    %c0_i32_0 = arith.constant 0 : i32
    return %arg0, %c0_i32, %arg1 : i32, i32, i32
  }
  func.func @transform_3(%arg0: i32, %arg1: i32, %arg2: i32) -> (i32, i32) {
    %c0_i32 = arith.constant 0 : i32
    %c0_i32_0 = arith.constant 0 : i32
    %c0_i32_1 = arith.constant 0 : i32
    return %c0_i32, %c0_i32_0 : i32, i32
  }
  func.func @transform_4(%arg0: i32, %arg1: i32, %arg2: i32) -> (i32, i32) {
    %c0_i32 = arith.constant 0 : i32
    %c0_i32_0 = arith.constant 0 : i32
    %c0_i32_1 = arith.constant 0 : i32
    return %c0_i32, %c0_i32_0 : i32, i32
  }
}

module attributes {stable_mosaic.version = 11 : i64} {
  func.func @_bn_relu_kernel(%arg0: i32, %arg1: i32, %arg2: memref<1x8x512xf32, #tpu.memory_space<vmem>>, %arg3: memref<8x1xf32, #tpu.memory_space<vmem>>, %arg4: memref<8x1xf32, #tpu.memory_space<vmem>>, %arg5: memref<1x8x512xf32, #tpu.memory_space<vmem>>) attributes {dimension_semantics = [#tpu.dimension_semantics<parallel>, #tpu.dimension_semantics<parallel>], iteration_bounds = array<i64: 2, 1>, scalar_prefetch = 0 : i64, scratch_operands = 0 : i64, tpu.core_type = #tpu.core_type<tc>, window_params = [{transform_indices = @transform_0, window_bounds = array<i64: 1, 8, 512>}, {pipeline_mode = #tpu.pipeline_mode<synchronous>, transform_indices = @transform_1, window_bounds = array<i64: 8, 1>}, {pipeline_mode = #tpu.pipeline_mode<synchronous>, transform_indices = @transform_2, window_bounds = array<i64: 8, 1>}, {transform_indices = @transform_3, window_bounds = array<i64: 1, 8, 512>}]} {
    %c0 = arith.constant 0 : index
    %c0_0 = arith.constant 0 : index
    %c0_1 = arith.constant 0 : index
    %0 = vector.load %arg2[%c0, %c0_0, %c0_1] : memref<1x8x512xf32, #tpu.memory_space<vmem>>, vector<1x8x512xf32>
    %1 = vector.shape_cast %0 : vector<1x8x512xf32> to vector<8x512xf32>
    %c0_2 = arith.constant 0 : index
    %c0_3 = arith.constant 0 : index
    %2 = vector.load %arg3[%c0_2, %c0_3] : memref<8x1xf32, #tpu.memory_space<vmem>>, vector<8x1xf32>
    %3 = vector.broadcast %2 : vector<8x1xf32> to vector<8x512xf32>
    %4 = arith.mulf %1, %3 : vector<8x512xf32>
    %c0_4 = arith.constant 0 : index
    %c0_5 = arith.constant 0 : index
    %5 = vector.load %arg4[%c0_4, %c0_5] : memref<8x1xf32, #tpu.memory_space<vmem>>, vector<8x1xf32>
    %6 = vector.broadcast %5 : vector<8x1xf32> to vector<8x512xf32>
    %7 = arith.addf %4, %6 : vector<8x512xf32>
    %cst = arith.constant 0.000000e+00 : f32
    %8 = vector.broadcast %cst : f32 to vector<8x512xf32>
    %9 = arith.maximumf %7, %8 : vector<8x512xf32>
    %c0_6 = arith.constant 0 : index
    %c0_7 = arith.constant 0 : index
    %c0_8 = arith.constant 0 : index
    %10 = vector.load %arg5[%c0_6, %c0_7, %c0_8] : memref<1x8x512xf32, #tpu.memory_space<vmem>>, vector<1x8x512xf32>
    %11 = vector.shape_cast %10 : vector<1x8x512xf32> to vector<8x512xf32>
    %12 = vector.shape_cast %9 : vector<8x512xf32> to vector<1x8x512xf32>
    tpu.vector_store %arg5[%c0_6, %c0_7, %c0_8], %12 {strides = array<i32>} : memref<1x8x512xf32, #tpu.memory_space<vmem>>, vector<1x8x512xf32>,
    return
  }
  func.func @transform_0(%arg0: i32, %arg1: i32) -> (i32, i32, i32) {
    %c0_i32 = arith.constant 0 : i32
    %c0_i32_0 = arith.constant 0 : i32
    return %arg0, %c0_i32, %arg1 : i32, i32, i32
  }
  func.func @transform_1(%arg0: i32, %arg1: i32) -> (i32, i32) {
    %c0_i32 = arith.constant 0 : i32
    %c0_i32_0 = arith.constant 0 : i32
    %c0_i32_1 = arith.constant 0 : i32
    return %c0_i32, %c0_i32_0 : i32, i32
  }
  func.func @transform_2(%arg0: i32, %arg1: i32) -> (i32, i32) {
    %c0_i32 = arith.constant 0 : i32
    %c0_i32_0 = arith.constant 0 : i32
    %c0_i32_1 = arith.constant 0 : i32
    return %c0_i32, %c0_i32_0 : i32, i32
  }
  func.func @transform_3(%arg0: i32, %arg1: i32) -> (i32, i32, i32) {
    %c0_i32 = arith.constant 0 : i32
    %c0_i32_0 = arith.constant 0 : i32
    return %arg0, %c0_i32, %arg1 : i32, i32, i32
  }
}

</mosaic_0001>

<bundles_post_ra>
// kernel: conv_bn_relu_forward.3
= control target key start
LH: loop header
LB: loop body
LE: loop exit
PB: predicated region body
PF: predicated region fallthrough
CT: control target
= control target key end

     0   :  { %s413_s12 = smov 0   ;;  %s415_s13 = smov 0   ;;  %s452_s0 = inlined_call_operand.vmem [shape: f32[2,8,512], index: 0, kind: input, shape index: {}, may-alias: {0,3}]   ;;  %s453_s1 = inlined_call_operand.vmem [shape: f32[8,1], index: 1, kind: input, shape index: {}]   ;;  %s454_s2 = inlined_call_operand.vmem [shape: f32[8,1], index: 2, kind: input, shape index: {}]   ;;  %s455_s3 = inlined_call_operand.vmem [shape: f32[2,8,512], index: 3, kind: output, shape index: {}, may-alias: {0,3}]  }
   0x1   :  { %s417_s14 = smov 0  }
   0x2 LB: > { %s25_s15 = sadd.s32 1, %s386_s13  ;;  %p333_p0 = scmp.ge.s32.totalorder %s390_s14, 1  ;;  %s390_s14 = sphi %s417_s14, %s13_s14   ;;  %s386_s13 = sphi %s415_s13, %s457_s13   ;;  %s382_s12 = sphi %s413_s12, %s456_s12  }
   0x3   : > { %p27_p1 = scmp.ge.s32.totalorder %s25_s15, 2  ;;  %p158_p2 = scmp.lt.s32.totalorder %s390_s14, 3 }
   0x5   : > { %s459_s15 = smov (%p27_p1, %s25_s15), 0  ;;  %p159_p3 = pnand %p333_p0, %p158_p2 }
   0x6   : > { %p191_p4 = scmp.lt.s32.totalorder (!%p159_p3), %s382_s12, 1 }
   0x7   : > { %162 = sbr.rel (%p159_p3) target bundleno = 148 (0x94), region = 32 }
   0xc   : > { %v214_v0 = vld [vmem:[%s453_s1] sm:$0xff]  ;;  %v392_v1 = vmov 0   ;;  %s461_s12 = smov (!%p191_p4, %s382_s12), 1 }
   0xd   : > { %367 = vset.pattern.permute.xlu0 %v392_v1  ;;  %v224_v2 = vld [vmem:[%s454_s2] sm:$0xff]  ;;  %s340_s20 = sshll.u32 %s461_s12, 5 }
   0xe   : > { %217 = vperm.xlu0 %367, %v214_v0   ;;  %s198_s23 = scalar_lea.vmem %s452_s0, %s340_s20  ;;  %s208_s26 = scalar_lea.vmem %s455_s3, %s340_s20 }
   0xf   : > { %v210_v3 = vld [vmem:[%s198_s23] sm:$0xff]  ;;  %v211_v5 = vld [vmem:[%s198_s23 + $0x8] sm:$0xff]  ;;  %v212_v6 = vld [vmem:[%s198_s23 + $0x10] sm:$0xff] }
  0x10   : > { %v213_v7 = vld [vmem:[%s198_s23 + $0x18] sm:$0xff] }
  0x12   : > { %227 = vperm.xlu0 %367, %v224_v2  }
  0x89   : > { %v218_v4 = vpop.permute.xlu0 %217 }
  0x8a   : > { %v220_v8 = vmul.f32 %v218_v4, %v210_v3  ;;  %v221_v9 = vmul.f32 %v218_v4, %v211_v5  ;;  %v222_v10 = vmul.f32 %v218_v4, %v212_v6  ;;  %v223_v11 = vmul.f32 %v218_v4, %v213_v7 }
  0x8d   : > { %v228_v12 = vpop.permute.xlu0 %227 }
  0x8e   : > { %v230_v13 = vadd.f32 %v228_v12, %v220_v8  ;;  %v231_v14 = vadd.f32 %v228_v12, %v221_v9  ;;  %v232_v15 = vadd.f32 %v228_v12, %v222_v10  ;;  %v233_v16 = vadd.f32 %v228_v12, %v223_v11 }
  0x90   : > { %v234_v17 = vmax.f32 %v230_v13, 0.0  ;;  %v235_v18 = vmax.f32 %v231_v14, 0.0  ;;  %v236_v19 = vmax.f32 %v232_v15, 0.0  ;;  %v237_v20 = vmax.f32 %v233_v16, 0.0 }
  0x92   : > { %238 = vst [vmem:[%s208_s26] sm:$0xff] %v234_v17  ;;  %239 = vst [vmem:[%s208_s26 + $0x8] sm:$0xff] %v235_v18 }
  0x93   : > { %240 = vst [vmem:[%s208_s26 + $0x10] sm:$0xff] %v236_v19  ;;  %241 = vst [vmem:[%s208_s26 + $0x18] sm:$0xff] %v237_v20 }
  0x94 PF: > { %s13_s14 = sadd.s32 1, %s390_s14   ;;  %s456_s12 = smov %s386_s13 }
  0x95   : > { %p10_p5 = scmp.ge.s32.totalorder %s13_s14, 4   ;;  %s457_s13 = smov %s459_s15 }
  0x97   :  { %12 = sbr.rel (!%p10_p5) target bundleno = 2 (0x2), region = 62 }

// kernel: conv_bn_relu_forward.2
= control target key start
LH: loop header
LB: loop body
LE: loop exit
PB: predicated region body
PF: predicated region fallthrough
CT: control target
= control target key end

     0   :  { %s912_s15 = smov 0   ;;  %s914_s16 = smov 0   ;;  %s1006_s0 = inlined_call_operand.vmem [shape: bf16[8,128], index: 0, kind: input, shape index: {}]   ;;  %s1007_s1 = inlined_call_operand.vmem [shape: bf16[2,128,512], index: 1, kind: input, shape index: {}]   ;;  %s1008_s2 = inlined_call_operand.vmem [shape: f32[2,8,512], index: 2, kind: output, shape index: {0}]   ;;  %s1009_s3 = inlined_call_operand.vmem [shape: f32[8,1], index: 3, kind: output, shape index: {1}]   ;;  %s1010_s4 = inlined_call_operand.vmem [shape: f32[8,1], index: 4, kind: output, shape index: {2}]  }
   0x1   :  { %s916_s17 = smov 0  }
   0x2 LB: > { %s34_s18 = sadd.s32 1, %s879_s16  ;;  %p742_p0 = scmp.ge.s32.totalorder %s883_s17, 1  ;;  %s883_s17 = sphi %s916_s17, %s15_s17   ;;  %s879_s16 = sphi %s914_s16, %s1012_s16   ;;  %s875_s15 = sphi %s912_s15, %s1011_s15  }
   0x3   : > { %p36_p1 = scmp.ge.s32.totalorder %s34_s18, 2  ;;  %p202_p2 = scmp.lt.s32.totalorder %s883_s17, 3 }
   0x5   : > { %s1014_s18 = smov (%p36_p1, %s34_s18), 0  ;;  %p203_p3 = pnand %p742_p0, %p202_p2 }
   0x6   : > { %p251_p4 = scmp.lt.s32.totalorder (!%p203_p3), %s875_s15, 1  ;;  %p276_p5 = scmp.eq.s32.totalorder (!%p203_p3), %s875_s15, 0 }
   0x7   : > { %206 = sbr.rel (%p203_p3) target bundleno = 397 (0x18d), region = 28 }
   0xc   : > { %s1016_s15 = smov (!%p251_p4, %s875_s15), 1  ;;  %284 = sbr.rel (!%p276_p5) target bundleno = 17 (0x11), region = 32  ;;  %vm285_vm0 = vcmask (%p276_p5), 7168   ;;  %v885_v0 = vmov (%p276_p5), 0.0  }
   0xd   : > { %s783_s19 = sshll.u32 %s1016_s15, 8  ;;  %s784_s20 = sshll.u32 %s1016_s15, 5  ;;  %286 = vst.msk [vmem:[%s1009_s3] sm:$0xff] (%p276_p5), %vm285_vm0, %v885_v0  ;;  %287 = vst.msk [vmem:[%s1010_s4] sm:$0xff] (%p276_p5), %vm285_vm0, %v885_v0 }
   0xe   : > { %s933_s23 = scalar_lea.vmem %s1007_s1, %s783_s19  ;;  %s938_s26 = scalar_lea.vmem %s1008_s2, %s784_s20 }
  0x11 PF: > { %v813_v1 = vld [vmem:[%s933_s23 + $0xe4] ss:$16 sps:$4 sm:$0xff]   ;;  %v815_v2 = vld [vmem:[%s933_s23 + $0xec] ss:$16 sps:$4 sm:$0xff]   ;;  %v886_v3 = vmov 0   ;;  %vm600_vm1 = vcmask 7168  }
  0x12   : > { %524 = vmatprep.mubr.bf16.mxu0 %v886_v3  ;;  %565 = vmatprep.mubr.bf16.mxu1 %v886_v3  ;;  %v817_v4 = vld [vmem:[%s933_s23 + $0xe0] ss:$16 sps:$4 sm:$0xff]   ;;  %v818_v5 = vld [vmem:[%s933_s23 + $0xe8] ss:$16 sps:$4 sm:$0xff]   ;;  %v819_v6 = vld [vmem:[%s933_s23 + $0xc4] ss:$16 sps:$4 sm:$0xff]  }
  0x13   : > { %492 = vmatprep.subr.bf16.mxu0 %v813_v1  ;;  %533 = vmatprep.subr.bf16.mxu1 %v815_v2  ;;  %v821_v7 = vld [vmem:[%s933_s23 + $0xcc] ss:$16 sps:$4 sm:$0xff]   ;;  %v823_v8 = vld [vmem:[%s933_s23 + $0xc0] ss:$16 sps:$4 sm:$0xff]   ;;  %v824_v9 = vld [vmem:[%s933_s23 + $0xc8] ss:$16 sps:$4 sm:$0xff]  }
  0x14   : > { %493 = vmatpush1.bf16.msra.mxu0 %v817_v4  ;;  %534 = vmatpush1.bf16.msra.mxu1 %v818_v5  ;;  %v825_v10 = vld [vmem:[%s933_s23 + $0xa4] ss:$16 sps:$4 sm:$0xff]   ;;  %v827_v11 = vld [vmem:[%s933_s23 + $0xac] ss:$16 sps:$4 sm:$0xff]   ;;  %v829_v12 = vld [vmem:[%s933_s23 + $0xa0] ss:$16 sps:$4 sm:$0xff]  }
  0x15   : > { %494 = vmatprep.subr.bf16.mxu0 %v819_v6  ;;  %535 = vmatprep.subr.bf16.mxu1 %v821_v7  ;;  %v830_v13 = vld [vmem:[%s933_s23 + $0xa8] ss:$16 sps:$4 sm:$0xff]   ;;  %v831_v14 = vld [vmem:[%s933_s23 + $0x84] ss:$16 sps:$4 sm:$0xff]   ;;  %v833_v15 = vld [vmem:[%s933_s23 + $0x8c] ss:$16 sps:$4 sm:$0xff]  }
  0x16   : > { %v835_v16 = vld [vmem:[%s933_s23 + $0x80] ss:$16 sps:$4 sm:$0xff]   ;;  %v836_v17 = vld [vmem:[%s933_s23 + $0x88] ss:$16 sps:$4 sm:$0xff]   ;;  %v837_v18 = vld [vmem:[%s933_s23 + $0x64] ss:$16 sps:$4 sm:$0xff]  }
  0x17   : > { %v839_v19 = vld [vmem:[%s933_s23 + $0x6c] ss:$16 sps:$4 sm:$0xff]   ;;  %v841_v20 = vld [vmem:[%s933_s23 + $0x60] ss:$16 sps:$4 sm:$0xff]   ;;  %v842_v21 = vld [vmem:[%s933_s23 + $0x68] ss:$16 sps:$4 sm:$0xff]  }
  0x18   : > { %495 = vmatpush1.bf16.msra.mxu0 %v823_v8  ;;  %536 = vmatpush1.bf16.msra.mxu1 %v824_v9  ;;  %v843_v22 = vld [vmem:[%s933_s23 + $0x44] ss:$16 sps:$4 sm:$0xff]   ;;  %v845_v23 = vld [vmem:[%s933_s23 + $0x4c] ss:$16 sps:$4 sm:$0xff]   ;;  %v847_v24 = vld [vmem:[%s933_s23 + $0x40] ss:$16 sps:$4 sm:$0xff]  }
  0x19   : > { %496 = vmatprep.subr.bf16.mxu0 %v825_v10  ;;  %537 = vmatprep.subr.bf16.mxu1 %v827_v11  ;;  %v848_v25 = vld [vmem:[%s933_s23 + $0x48] ss:$16 sps:$4 sm:$0xff]   ;;  %v849_v26 = vld [vmem:[%s933_s23 + $0x24] ss:$16 sps:$4 sm:$0xff]   ;;  %v851_v27 = vld [vmem:[%s933_s23 + $0x2c] ss:$16 sps:$4 sm:$0xff]  }
  0x1a   : > { %v853_v28 = vld [vmem:[%s933_s23 + $0x20] ss:$16 sps:$4 sm:$0xff]   ;;  %v854_v29 = vld [vmem:[%s933_s23 + $0x28] ss:$16 sps:$4 sm:$0xff]   ;;  %v855_v30 = vld [vmem:[%s933_s23 + $0x4] ss:$16 sps:$4 sm:$0xff]  }
  0x1b   : > { %v857_v31 = vld [vmem:[%s933_s23 + $0xc] ss:$16 sps:$4 sm:$0xff]   ;;  %v859_v32 = vld [vmem:[%s933_s23] ss:$16 sps:$4 sm:$0xff]   ;;  %v860_v33 = vld [vmem:[%s933_s23 + $0x8] ss:$16 sps:$4 sm:$0xff]  }
  0x1c   : > { %497 = vmatpush1.bf16.msra.mxu0 %v829_v12  ;;  %538 = vmatpush1.bf16.msra.mxu1 %v830_v13  ;;  %v299_v34 = vld [vmem:[%s1006_s0] sm:$0xf] }
  0x1d   : > { %498 = vmatprep.subr.bf16.mxu0 %v831_v14  ;;  %539 = vmatprep.subr.bf16.mxu1 %v833_v15  ;;  %v593_v53 = vld [vmem:[%s1009_s3] sm:$0xff] }
  0x1e   : > { %v602_v56 = vld [vmem:[%s1010_s4] sm:$0xff] }
  0x20   : > { %499 = vmatpush1.bf16.msra.mxu0 %v835_v16  ;;  %540 = vmatpush1.bf16.msra.mxu1 %v836_v17 }
  0x21   : > { %500 = vmatprep.subr.bf16.mxu0 %v837_v18  ;;  %541 = vmatprep.subr.bf16.mxu1 %v839_v19 }
  0x24   : > { %501 = vmatpush1.bf16.msra.mxu0 %v841_v20  ;;  %542 = vmatpush1.bf16.msra.mxu1 %v842_v21 }
  0x25   : > { %502 = vmatprep.subr.bf16.mxu0 %v843_v22  ;;  %543 = vmatprep.subr.bf16.mxu1 %v845_v23 }
  0x28   : > { %503 = vmatpush1.bf16.msra.mxu0 %v847_v24  ;;  %544 = vmatpush1.bf16.msra.mxu1 %v848_v25 }
  0x29   : > { %504 = vmatprep.subr.bf16.mxu0 %v849_v26  ;;  %545 = vmatprep.subr.bf16.mxu1 %v851_v27 }
  0x2c   : > { %505 = vmatpush1.bf16.msra.mxu0 %v853_v28  ;;  %546 = vmatpush1.bf16.msra.mxu1 %v854_v29 }
  0x2d   : > { %506 = vmatprep.subr.bf16.mxu0 %v855_v30  ;;  %547 = vmatprep.subr.bf16.mxu1 %v857_v31 }
  0x30   : > { %507 = vmatpush1.bf16.msra.mxu0 %v859_v32  ;;  %548 = vmatpush1.bf16.msra.mxu1 %v860_v33 }
  0x33   : > { %525 = vmatmul.mubr.bf16.vlgmr.msra.gmra.mxu0 %v299_v34  ;;  %566 = vmatmul.mubr.bf16.vlgmr.msra.gmra.mxu1 %v299_v34 }
  0xf3   : > { %v526_v35 = vpop.f32.mrf.mxu0  ;;  %v567_v36 = vpop.f32.mrf.mxu1 }
  0xf4   : > { %589 = vst [vmem:[%s938_s26] sm:$0xff] %v526_v35  ;;  %591 = vst [vmem:[%s938_s26 + $0x10] sm:$0xff] %v567_v36  ;;  %v603_v39 = vmul.f32 %v526_v35, %v526_v35  ;;  %v605_v40 = vmul.f32 %v567_v36, %v567_v36 }
  0xf5   : > { %v528_v37 = vpop.f32.mrf.mxu0  ;;  %v569_v38 = vpop.f32.mrf.mxu1 }
  0xf6   : > { %590 = vst [vmem:[%s938_s26 + $0x8] sm:$0xff] %v528_v37  ;;  %v594_v41 = vadd.f32 %v528_v37, %v526_v35  ;;  %v604_v42 = vmul.f32 %v528_v37, %v528_v37  ;;  %592 = vst [vmem:[%s938_s26 + $0x18] sm:$0xff] %v569_v38  ;;  %v606_v51 = vmul.f32 %v569_v38, %v569_v38 }
  0xf7   : > { %v530_v43 = vpop.f32.mrf.mxu0  ;;  %v571_v44 = vpop.f32.mrf.mxu1 }
  0xf8   : > { %v595_v45 = vadd.f32 %v594_v41, %v567_v36  ;;  %v607_v46 = vadd.f32 %v604_v42, %v603_v39 }
  0xf9   : > { %v531_v47 = vpop.f32.mrf.mxu0  ;;  %v572_v48 = vpop.f32.mrf.mxu1 }
  0xfa   : > { %v596_v49 = vadd.f32 %v595_v45, %v569_v38  ;;  %v608_v50 = vadd.f32 %v607_v46, %v605_v40 }
  0xfc   : > { %597 = vadd.xlane.f32.xlu0 %v596_v49  ;;  %v609_v52 = vadd.f32 %v608_v50, %v606_v51 }
 0x100   : > { %610 = vadd.xlane.f32.xlu0 %v609_v52 }
 0x185   : > { %v598_v54 = vpop.xlane.xlu0 %597 }
 0x186   : > { %v599_v55 = vadd.f32 %v598_v54, %v593_v53 }
 0x188   : > { %601 = vst.msk [vmem:[%s1009_s3] sm:$0xff] %vm600_vm1, %v599_v55 }
 0x189   : > { %v611_v57 = vpop.xlane.xlu0 %610 }
 0x18a   : > { %v612_v58 = vadd.f32 %v611_v57, %v602_v56 }
 0x18c   : > { %613 = vst.msk [vmem:[%s1010_s4] sm:$0xff] %vm600_vm1, %v612_v58 }
 0x18d PF: > { %s15_s17 = sadd.s32 1, %s883_s17   ;;  %s1011_s15 = smov %s879_s16 }
 0x18e   : > { %p12_p6 = scmp.ge.s32.totalorder %s15_s17, 4   ;;  %s1012_s16 = smov %s1014_s18 }
 0x190   :  { %14 = sbr.rel (!%p12_p6) target bundleno = 2 (0x2), region = 89 }

</bundles_post_ra>
